<compile_context>
chip_gen: v7x
topology: tpu7x:2x2x1
jax: 0.10.0
libtpu: 0.0.40
codegen_flags: <defaults>
</compile_context>

<pallas_src>
import math

import jax
import jax.numpy as jnp
from jax.experimental import pallas as pl
from jax.experimental.pallas import tpu as pltpu


def _round_up(x, m):
    return (x + m - 1) // m * m


def _packing_plan(in_features, out_features, *, max_kp=2048, max_weight_bytes=4 << 20):
    """Pick (pack, out_pad) so pack*out_pad is a multiple of 128 (dense stores)
    while the packed weight / K stay small enough to keep the kernel mem-bound."""
    pack = 128 // math.gcd(out_features, 128)
    kp = pack * in_features
    np_ = pack * out_features
    if pack > 1 and (kp > max_kp or kp * np_ * 4 > max_weight_bytes):
        # TODO(synk): could search intermediate pack values here; fall back to
        # column padding instead (still lane-dense, just more write padding).
        pack = 1
    out_pad = out_features
    if (pack * out_pad) % 128 != 0:
        out_pad = _round_up(out_features, 128)
    return pack, out_pad


def fuse_time2vec_params(w, b, w0, b0):
    """Fuse + lane-dense-pack the Time2Vec parameters. Call ONCE at build time."""
    W = jnp.concatenate([w, w0], axis=1)                     # [in, out]
    bias = jnp.concatenate([b, jnp.reshape(b0, (-1,))], 0)   # [out]
    in_features, out_features = W.shape
    pack, out_pad = _packing_plan(in_features, out_features)

    if out_pad != out_features:
        W = jnp.pad(W, ((0, 0), (0, out_pad - out_features)))
        bias = jnp.pad(bias, (0, out_pad - out_features))

    kp = pack * in_features
    np_ = pack * out_pad
    if pack > 1:
        w_packed = jnp.kron(jnp.eye(pack, dtype=W.dtype), W)  # [pack*in, pack*out_pad]
    else:
        w_packed = W
    b_packed = jnp.tile(bias, pack).reshape(1, np_)

    # Precomputed sin/identity column selector (1.0 -> periodic sin column,
    # 0.0 -> identity column / padding).  Replaces per-tile iota + modulo.
    col = jnp.arange(np_) % out_pad
    mask = (col < out_features - 1).astype(jnp.float32).reshape(1, np_)

    return dict(
        w=w_packed, b=b_packed, mask=mask,
        in_features=in_features, out_features=out_features,
        out_pad=out_pad, pack=pack,
    )


def _t2v_sine_kernel(tau_ref, w_ref, b_ref, m_ref, o_ref):
    # Fused matmul + bias, f32 accumulation (MXU), sin on EUP, select on VPU.
    z = jnp.dot(tau_ref[...], w_ref[...], preferred_element_type=jnp.float32)
    z = z + b_ref[...]                       # (1, np_) broadcast over row tile
    m = m_ref[...]
    o_ref[...] = jnp.where(m > 0, jnp.sin(z), z).astype(o_ref.dtype)


def sine_activation(tau, params, *, block_rows=None, out_dtype=jnp.float32):
    """tau: [B, in_features] -> [B, out_features] in `out_dtype`."""
    B, in_features = tau.shape
    assert in_features == params["in_features"]
    pack = params["pack"]
    out_pad = params["out_pad"]
    out_features = params["out_features"]
    w_packed, b_packed, mask = params["w"], params["b"], params["mask"]
    kp, np_ = w_packed.shape

    # Pad only to the pack*8 sublane alignment (NOT to a tile multiple); the
    # ragged last grid step is handled by pl.cdiv + Pallas block masking.
    rows_raw = pl.cdiv(B, pack)
    rows = _round_up(max(rows_raw, 1), 8)
    b_pad = rows * pack
    tau_p = tau if b_pad == B else jnp.pad(tau, ((0, b_pad - B), (0, 0)))
    tau_p = tau_p.reshape(rows, kp)

    # Row-tile sizing: big tiles (target 8192 rows) to amortize ~0.35us/step,
    # bounded by a ~24 MiB double-buffered VMEM working set (v7x-safe).
    out_bytes = jnp.dtype(out_dtype).itemsize
    in_bytes = jnp.dtype(tau_p.dtype).itemsize
    resident = w_packed.size * w_packed.dtype.itemsize + 2 * np_ * 4
    per_row = 2 * (kp * in_bytes + np_ * out_bytes)          # double-buffered in+out
    vmem_budget = 24 << 20
    tb_cap = max(8, (vmem_budget - resident) // per_row)
    tb = block_rows if block_rows is not None else 8192
    tb = int(min(tb, tb_cap, rows))
    tb = max(8, (tb // 8) * 8)
    # Keep >= 2 independent row tiles when possible so "parallel" feeds both
    # TensorCores on v7x (neutral on v5e/v6e).
    if rows >= 16 and tb >= rows:
        tb = _round_up(pl.cdiv(rows, 2), 8)
    grid = pl.cdiv(rows, tb)

    out_p = pl.pallas_call(
        _t2v_sine_kernel,
        out_shape=jax.ShapeDtypeStruct((rows, np_), out_dtype),
        grid_spec=pltpu.PrefetchScalarGridSpec(
            num_scalar_prefetch=0,
            grid=(grid,),
            in_specs=[
                pl.BlockSpec((tb, kp), lambda i: (i, 0)),    # streamed row tile
                pl.BlockSpec((kp, np_), lambda i: (0, 0)),   # resident weights
                pl.BlockSpec((1, np_), lambda i: (0, 0)),    # resident bias
                pl.BlockSpec((1, np_), lambda i: (0, 0)),    # resident sin/id mask
            ],
            out_specs=pl.BlockSpec((tb, np_), lambda i: (i, 0)),
        ),
        compiler_params=pltpu.CompilerParams(
            dimension_semantics=("parallel",),
            vmem_limit_bytes=48 * 1024 * 1024,
        ),
    )(tau_p, w_packed, b_packed, mask)

    out = out_p.reshape(b_pad, out_pad)
    if out_pad != out_features:
        out = out[:, :out_features]
    return out[:B]


def _reference(tau, w, b, w0, b0):
    v1 = jnp.sin(tau @ w + b)
    v2 = tau @ w0 + b0
    return jnp.concatenate([v1, v2], axis=1)


def _make_params(key, in_features, out_features):
    k_w0, k_b0, k_w, k_b = jax.random.split(key, 4)
    w0 = jax.random.normal(k_w0, (in_features, 1), dtype=jnp.float32)
    b0 = jax.random.normal(k_b0, (1,), dtype=jnp.float32)
    w = jax.random.normal(k_w, (in_features, out_features - 1), dtype=jnp.float32)
    b = jax.random.normal(k_b, (out_features - 1,), dtype=jnp.float32)
    return w, b, w0, b0


if __name__ == "__main__":
    key = jax.random.PRNGKey(0)
    k_p1, k_p2, k_t1, k_t2, k_t3 = jax.random.split(key, 5)

    # Case 1: out_features divides 128 (pack=4), batch=16.
    in_features, out_features = 8, 32
    w, b, w0, b0 = _make_params(k_p1, in_features, out_features)
    params = fuse_time2vec_params(w, b, w0, b0)        # build-time packing

    tau = jax.random.normal(k_t1, (16, in_features), dtype=jnp.float32)
    out = jax.block_until_ready(sine_activation(tau, params))
    ref = _reference(tau, w, b, w0, b0)
    assert out.shape == (16, out_features)
    assert jnp.allclose(out, ref, atol=1e-5, rtol=1e-5)

    # Ragged batch (not a multiple of the pack factor) exercises padding/cdiv.
    tau2 = jax.random.normal(k_t2, (13, in_features), dtype=jnp.float32)
    out2 = jax.block_until_ready(sine_activation(tau2, params))
    ref2 = _reference(tau2, w, b, w0, b0)
    assert out2.shape == (13, out_features)
    assert jnp.allclose(out2, ref2, atol=1e-5, rtol=1e-5)

    # bf16 writeback path (compute stays f32), loose tolerance.
    out_bf = jax.block_until_ready(
        sine_activation(tau, params, out_dtype=jnp.bfloat16)
    )
    assert out_bf.dtype == jnp.bfloat16
    assert float(jnp.max(jnp.abs(out_bf.astype(jnp.float32) - ref))) < 0.1

    # Case 2: out_features that does NOT divide 128 (generalized packing, pack=8).
    out_features_b = 48
    wB, bB, w0B, b0B = _make_params(k_p2, in_features, out_features_b)
    params_b = fuse_time2vec_params(wB, bB, w0B, b0B)
    tau3 = jax.random.normal(k_t3, (13, in_features), dtype=jnp.float32)
    out3 = jax.block_until_ready(sine_activation(tau3, params_b))
    ref3 = _reference(tau3, wB, bB, w0B, b0B)
    assert out3.shape == (13, out_features_b)
    assert jnp.allclose(out3, ref3, atol=1e-5, rtol=1e-5)

    print("KERNEL_OK")
</pallas_src>

<mosaic_0001>
module attributes {stable_mosaic.version = 11 : i64} {
  func.func @_t2v_sine_kernel(%arg0: i32, %arg1: memref<8x32xf32, #tpu.memory_space<vmem>>, %arg2: memref<32x128xf32, #tpu.memory_space<vmem>>, %arg3: memref<1x128xf32, #tpu.memory_space<vmem>>, %arg4: memref<1x128xf32, #tpu.memory_space<vmem>>, %arg5: memref<8x128xf32, #tpu.memory_space<vmem>>) attributes {dimension_semantics = [#tpu.dimension_semantics<parallel>], iteration_bounds = array<i64: 1>, scalar_prefetch = 0 : i64, scratch_operands = 0 : i64, tpu.core_type = #tpu.core_type<tc>, window_params = [{transform_indices = @transform_0, window_bounds = array<i64: 8, 32>}, {pipeline_mode = #tpu.pipeline_mode<synchronous>, transform_indices = @transform_1, window_bounds = array<i64: 32, 128>}, {pipeline_mode = #tpu.pipeline_mode<synchronous>, transform_indices = @transform_2, window_bounds = array<i64: 1, 128>}, {pipeline_mode = #tpu.pipeline_mode<synchronous>, transform_indices = @transform_3, window_bounds = array<i64: 1, 128>}, {transform_indices = @transform_4, window_bounds = array<i64: 8, 128>}]} {
    %c0 = arith.constant 0 : index
    %c0_0 = arith.constant 0 : index
    %0 = vector.load %arg1[%c0, %c0_0] : memref<8x32xf32, #tpu.memory_space<vmem>>, vector<8x32xf32>
    %c0_1 = arith.constant 0 : index
    %c0_2 = arith.constant 0 : index
    %1 = vector.load %arg2[%c0_1, %c0_2] : memref<32x128xf32, #tpu.memory_space<vmem>>, vector<32x128xf32>
    %cst = arith.constant dense<0.000000e+00> : vector<8x128xf32>
    %2 = tpu.matmul %0, %1, %cst {dimension_numbers = #tpu.dot_dimension_numbers<[1], [0], [0], [1], [0, 0, 1, 1], [], []>} : vector<8x32xf32>, vector<32x128xf32>, vector<8x128xf32> -> vector<8x128xf32>
    %c0_3 = arith.constant 0 : index
    %c0_4 = arith.constant 0 : index
    %3 = vector.load %arg3[%c0_3, %c0_4] : memref<1x128xf32, #tpu.memory_space<vmem>>, vector<1x128xf32>
    %4 = vector.broadcast %3 : vector<1x128xf32> to vector<8x128xf32>
    %5 = arith.addf %2, %4 : vector<8x128xf32>
    %c0_5 = arith.constant 0 : index
    %c0_6 = arith.constant 0 : index
    %6 = vector.load %arg4[%c0_5, %c0_6] : memref<1x128xf32, #tpu.memory_space<vmem>>, vector<1x128xf32>
    %cst_7 = arith.constant 0.000000e+00 : f32
    %7 = vector.broadcast %cst_7 : f32 to vector<1x128xf32>
    %8 = arith.cmpf ogt, %6, %7 : vector<1x128xf32>
    %9 = math.sin %5 : vector<8x128xf32>
    %10 = vector.shape_cast %8 : vector<1x128xi1> to vector<1x128xi1>
    %11 = vector.broadcast %10 : vector<1x128xi1> to vector<8x128xi1>
    %12 = arith.select %11, %9, %5 : vector<8x128xi1>, vector<8x128xf32>
    %c0_8 = arith.constant 0 : index
    %c0_9 = arith.constant 0 : index
    %13 = vector.load %arg5[%c0_8, %c0_9] : memref<8x128xf32, #tpu.memory_space<vmem>>, vector<8x128xf32>
    tpu.vector_store %arg5[%c0_8, %c0_9], %12 {strides = array<i32>} : memref<8x128xf32, #tpu.memory_space<vmem>>, vector<8x128xf32>,
    return
  }
  func.func @transform_0(%arg0: i32) -> (i32, i32) {
    %c0_i32 = arith.constant 0 : i32
    %c0_i32_0 = arith.constant 0 : i32
    return %arg0, %c0_i32 : i32, i32
  }
  func.func @transform_1(%arg0: i32) -> (i32, i32) {
    %c0_i32 = arith.constant 0 : i32
    %c0_i32_0 = arith.constant 0 : i32
    %c0_i32_1 = arith.constant 0 : i32
    return %c0_i32, %c0_i32_0 : i32, i32
  }
  func.func @transform_2(%arg0: i32) -> (i32, i32) {
    %c0_i32 = arith.constant 0 : i32
    %c0_i32_0 = arith.constant 0 : i32
    %c0_i32_1 = arith.constant 0 : i32
    return %c0_i32, %c0_i32_0 : i32, i32
  }
  func.func @transform_3(%arg0: i32) -> (i32, i32) {
    %c0_i32 = arith.constant 0 : i32
    %c0_i32_0 = arith.constant 0 : i32
    %c0_i32_1 = arith.constant 0 : i32
    return %c0_i32, %c0_i32_0 : i32, i32
  }
  func.func @transform_4(%arg0: i32) -> (i32, i32) {
    %c0_i32 = arith.constant 0 : i32
    %c0_i32_0 = arith.constant 0 : i32
    return %arg0, %c0_i32 : i32, i32
  }
}

</mosaic_0001>

<bundles_post_ra>
// kernel: tpu_custom_call.1
= control target key start
LH: loop header
LB: loop body
LE: loop exit
PB: predicated region body
PF: predicated region fallthrough
CT: control target
= control target key end

     0   :  { %9 = vsyncpa [#allocation3], 0  ;;  %s494_s0 = inlined_call_operand.hbm [shape: f32[8,32], index: 0, kind: input, shape index: {}]   ;;  %s495_s1 = inlined_call_operand.hbm [shape: f32[32,128], index: 1, kind: input, shape index: {}]   ;;  %s496_s2 = inlined_call_operand.vmem [shape: f32[1,128], index: 2, kind: input, shape index: {}]   ;;  %s497_s3 = inlined_call_operand.vmem [shape: f32[1,128], index: 3, kind: input, shape index: {}]   ;;  %s498_s4 = inlined_call_operand.hbm [shape: f32[8,128], index: 4, kind: output, shape index: {}]  }
   0x1   :  { %10 = vsyncpa [#allocation6], 0 }
   0x2   :  { %11 = vsyncpa [#allocation4], 0  ;;  %s383_s15 = smov [#allocation2]   ;;  %s384_s17 = smov [#allocation5]  }
   0x3   :  { %s18_s16 = sshll.u32 %s383_s15, 4  ;;  %s27_s18 = sshll.u32 %s384_s17, 4  ;;  %s19_s16 = int_to_ptr.vmem [resolvable:$true] %s18_s16  ;;  %s423_s18 = int_to_ptr.vmem [resolvable:$true] %s27_s18 }
   0x4   :  { %s311_s21 = scalar_lea.hbm %s494_s0, 128 }
   0x5   :  { %p312_p0 = scmp.ne.s32.totalorder %s494_s0, %s311_s21  ;;  %p315_p1 = scmp.lt.u32.totalorder %s311_s21, %s494_s0 }
   0x7   :  { %p317_p2 = pnand %p315_p1, %p312_p0 }
   0x9   :  { %320 = shalt.err (!%p317_p2)
}
   0xa   :  { %s321_s26 = scalar_lea.vmem %s19_s16, 128  ;;  %p326_p4 = scmp.lt.s32.totalorder %s19_s16, %s19_s16 }
   0xb   :  { %p322_p3 = scmp.ne.s32.totalorder %s19_s16, %s321_s26  ;;  %p327_p5 = scmp.lt.s32.totalorder %s321_s26, %s321_s26 }
   0xd   :  { %p328_p6 = por %p327_p5, %p326_p4 }
   0xf   :  { %p329_p7 = pnand %p328_p6, %p322_p3 }
  0x11   :  { %332 = shalt.err (!%p329_p7)
}
  0x12   :  { %21 = dma.hbm_to_vmem [thread:$0]  %s494_s0, 128, %s19_s16, [#allocation3]  }
  0x13   :  { %s333_s5 = scalar_lea.hbm %s495_s1, 512 }
  0x14   :  { %p334_p8 = scmp.ne.s32.totalorder %s495_s1, %s333_s5  ;;  %p337_p9 = scmp.lt.u32.totalorder %s333_s5, %s495_s1 }
  0x16   :  { %p339_p10 = pnand %p337_p9, %p334_p8 }
  0x18   :  { %342 = shalt.err (!%p339_p10)
}
  0x19   :  { %s343_s10 = scalar_lea.vmem %s423_s18, 512  ;;  %p348_p12 = scmp.lt.s32.totalorder %s423_s18, %s423_s18 }
  0x1a   :  { %p344_p11 = scmp.ne.s32.totalorder %s423_s18, %s343_s10  ;;  %p349_p13 = scmp.lt.s32.totalorder %s343_s10, %s343_s10 }
  0x1c   :  { %p350_p0 = por %p349_p13, %p348_p12 }
  0x1e   :  { %p351_p1 = pnand %p350_p0, %p344_p11 }
  0x20   :  { %354 = shalt.err (!%p351_p1)
}
  0x21   :  { %s385_s0 = smov 128   ;;  %s386_s11 = smov 8  }
  0x22   :  { %33 = dma.hbm_to_vmem [thread:$0]  %s495_s1, 512, %s423_s18, [#allocation6], %s385_s0, %s385_s0, %s386_s11  }
  0x23   :  { %377 = dma.done.wait [#allocation3], 128  }
  0x24   :  { %378 = vsyncadd [#allocation3], 4294967168 }
  0x25   :  { %379 = dma.done.wait [#allocation6], 512  }
  0x26   :  { %380 = vsyncadd [#allocation6], 4294966784  ;;  %v387_v0 = vmov 0.0|0.0   ;;  %vm388_vm0 = vmmov 0   ;;  %v389_v1 = vmov 0.0   ;;  %v45_v2 = vld [vmem:[#allocation5] sm:$0xff] }
  0x27   :  { %282 = vmatprep.subr.bf16.mxu0 %v387_v0  ;;  %279 = vmatprep.mubr.msk.f32.mxu0 %vm388_vm0, %v389_v1  ;;  %v46_v3 = vld [vmem:[#allocation5 + $0x8] sm:$0xff]  ;;  %v47_v4 = vld [vmem:[#allocation5 + $0x10] sm:$0xff]  ;;  %v48_v6 = vld [vmem:[#allocation5 + $0x18] sm:$0xff]  ;;  %vm56_vm1 = vcmask 261120   ;;  %v390_v24 = vmov 2102212464  }
  0x28   :  { %v283_v5 = vpack.c.bf16 %v46_v3, %v45_v2  ;;  %v286_v7 = vpack.c.bf16 %v48_v6, %v47_v4  ;;  %v44_v8 = vld [vmem:[#allocation2] sm:$0xff]  ;;  %v391_v26 = vmov 920167782   ;;  %v392_v30 = vmov 1326507024   ;;  %s397_s16 = smov [#allocation7]  }
  0x29   :  { %v260_v9 = vld [vmem:[%s496_s2] ss:$0 sm:$0xff]  ;;  %v393_v32 = vmov 683565275   ;;  %v394_v34 = vmov 2475754826  }
  0x2a   :  { %284 = vmatpush3.bf16.msra.mxu0 %v283_v5  ;;  %v395_v37 = vmov 2131351028   ;;  %s250_s17 = sshll.u32 %s397_s16, 4  ;;  %s251_s17 = int_to_ptr.vmem [resolvable:$true] %s250_s17 }
  0x2b   :  { %285 = vmatprep.subr.bf16.mxu0 %v387_v0  ;;  %p360_p3 = scmp.lt.s32.totalorder %s251_s17, %s251_s17 }
  0x2e   :  { %287 = vmatpush3.bf16.msra.mxu0 %v286_v7 }
  0x31   :  { %280 = vmatmul.mubr.msk.f32.vlgmr.msra.gmra.mrb[0].mxu0 %vm56_vm1, %v44_v8 }
 0x104   :  { %v126_v10 = vpop.f32.mrb[0].mxu0 }
 0x105   :  { %v457_v11 = vadd.f32 %v260_v9, %v126_v10  ;;  %v281_v12 = vpop.f32.mrb[1].mxu0 }
 0x107   :  { %v135_v13 = vand.u32 2139095040, %v457_v11  ;;  %v132_v14 = vand.u32 2147483647, %v457_v11  ;;  %vm134_vm9 = vcmp.lt.s32.totalorder %v457_v11, 0  ;;  %vm224_vm0 = vweird.f32 %v457_v11 }
 0x109   :  { %v136_v15 = vshrl.u32 %v135_v13, 23  ;;  %v139_v17 = vand.u32 8388607, %v132_v14  ;;  %vm133_vm10 = vcmp.le.f32.partialorder %v132_v14, 0.7853982 }
 0x10b   :  { %v262_v16 = vadd.s32 4294967169, %v136_v15  ;;  %v140_v20 = vor.u32 8388608, %v139_v17 }
 0x10d   :  { %v142_v18 = vadd.s32 1, %v262_v16  ;;  %v180_v28 = vshll.u32 %v140_v20, 8 }
 0x10f   :  { %vm143_vm2 = vcmp.gt.s32.totalorder %v142_v18, 0 }
 0x110   :  { %v144_v19 = vsel %vm143_vm2, %v142_v18, 0 }
 0x111   :  { %v146_v21 = vand.u32 31, %v144_v19  ;;  %v145_v22 = vshrl.u32 %v144_v19, 5 }
 0x113   :  { %v147_v23 = vsub.s32 32, %v146_v21  ;;  %v158_v25 = vshll.u32 %v390_v24, %v146_v21  ;;  %v161_v27 = vshll.u32 %v391_v26, %v146_v21  ;;  %v149_v33 = vshll.u32 %v393_v32, %v146_v21 }
 0x114   :  { %v152_v36 = vshll.u32 %v394_v34, %v146_v21  ;;  %v155_v39 = vshll.u32 %v395_v37, %v146_v21  ;;  %vm167_vm3 = vcmp.lt.s32.totalorder %v145_v22, 4  ;;  %vm164_vm4 = vcmp.lt.s32.totalorder %v145_v22, 1 }
 0x115   :  { %v159_v29 = vshrl.u32 %v391_v26, %v147_v23  ;;  %v162_v31 = vshrl.u32 %v392_v30, %v147_v23  ;;  %v150_v35 = vshrl.u32 %v394_v34, %v147_v23  ;;  %v153_v38 = vshrl.u32 %v395_v37, %v147_v23 }
 0x116   :  { %v156_v40 = vshrl.u32 %v390_v24, %v147_v23  ;;  %v148_v44 = vshrl.u32 %v393_v32, %v147_v23  ;;  %vm165_vm5 = vcmp.lt.s32.totalorder %v145_v22, 2  ;;  %vm166_vm6 = vcmp.lt.s32.totalorder %v145_v22, 3  ;;  %v130_v32 = vld [vmem:[%s497_s3] sm:$0x1]  ;;  %s355_s3 = scalar_lea.vmem %s251_s17, 128 }
 0x117   :  { %v160_v41 = vor.u32 %v159_v29, %v158_v25  ;;  %v163_v42 = vor.u32 %v162_v31, %v161_v27  ;;  %v151_v43 = vor.u32 %v150_v35, %v149_v33  ;;  %v154_v45 = vor.u32 %v153_v38, %v152_v36  ;;  %p356_p2 = scmp.ne.s32.totalorder %s251_s17, %s355_s3  ;;  %p361_p4 = scmp.lt.s32.totalorder %s355_s3, %s355_s3 }
 0x118   :  { %v157_v46 = vor.u32 %v156_v40, %v155_v39  ;;  %v237_v30 = vlaneseq  ;;  %vm131_vm11 = vcmp.gt.f32.partialorder %v130_v32, 0.0  ;;  %v396_v37 = vmov 0  }
 0x119   :  { %v173_v47 = vsel %vm167_vm3, %v160_v41, 920167782  ;;  %v177_v48 = vsel %vm167_vm3, %v163_v42, 1326507024  ;;  %v172_v50 = vsel %vm164_vm4, %v151_v43, %v154_v45  ;;  %v168_v53 = vsel %vm164_vm4, %v148_v44, %v151_v43  ;;  %p362_p5 = por %p361_p4, %p360_p3 }
 0x11a   :  { %v169_v49 = vsel %vm167_vm3, %v157_v46, 2102212464  ;;  %v174_v51 = vsel %vm166_vm6, %v157_v46, %v173_v47  ;;  %v176_v52 = vsel %vm164_vm4, %v154_v45, %v157_v46  ;;  %v178_v56 = vsel %vm166_vm6, %v160_v41, %v177_v48 }
 0x11b   :  { %v170_v54 = vsel %vm166_vm6, %v154_v45, %v169_v49  ;;  %v175_v55 = vsel %vm165_vm5, %v172_v50, %v174_v51  ;;  %v179_v57 = vsel %vm165_vm5, %v176_v52, %v178_v56  ;;  %v238_v34 = vshrl.u32 %v237_v30, 7  ;;  %p363_p6 = pnand %p362_p5, %p356_p2 }
 0x11c   :  { %v463_v58 = vmul.u32.u64.low %v180_v28, %v175_v55  ;;  %v464_v59 = vmul.u32.u64.high %v180_v28, %v175_v55, %v463_v58  ;;  %v466_v60 = vmul.u32.u64.low %v180_v28, %v179_v57  ;;  %v467_v61 = vmul.u32.u64.high %v180_v28, %v179_v57, %v466_v60 }
 0x11d   :  { %v171_v62 = vsel %vm165_vm5, %v168_v53, %v170_v54  ;;  %v239_v36 = vsub.s32 0, %v238_v34  ;;  %v236_v38 = vsel %vm131_vm11, 1, %v396_v37 }
 0x11e   :  { %v190_v63 = vadd.s32 1, %v464_v59  ;;  %v187_v0 = vmul.u32 %v180_v28, %v171_v62  ;;  %vm189_vm7 = vc.u32 %v467_v61, %v463_v58  ;;  %v188_v13 = vadd.s32 %v463_v58, %v467_v61 }
 0x11f   :  { %v240_v40 = vrot.slane %v236_v38, %v239_v36 }
 0x120   :  { %v191_v1 = vsel %vm189_vm7, %v190_v63, %v464_v59 }
 0x121   :  { %v192_v2 = vadd.s32 %v191_v1, %v187_v0  ;;  %vm241_vm15 = vcmp.eq.s32.totalorder %v240_v40, 1 }
 0x123   :  { %v193_v3 = vadd.s32 536870912, %v192_v2 }
 0x125   :  { %v194_v4 = vshrl.u32 %v193_v3, 30 }
 0x127   :  { %v195_v5 = vshll.u32 %v194_v4, 30  ;;  %v218_v26 = vsub.s32 4, %v194_v4 }
 0x129   :  { %v196_v6 = vsub.s32 %v192_v2, %v195_v5  ;;  %v219_v29 = vsel %vm134_vm9, %v218_v26, %v194_v4 }
 0x12a   :  { %v221_v33 = vsel %vm133_vm10, 0, %v219_v29 }
 0x12b   :  { %v198_v7 = vsub.s32 0, %v196_v6  ;;  %v225_v35 = vadd.s32 3, %v221_v33 }
 0x12d   :  { %v263_v8 = vmin.u32 %v198_v7, %v196_v6  ;;  %v226_v39 = vand.u32 3, %v225_v35 }
 0x12f   :  { %v200_v9 = vclz %v263_v8  ;;  %vm231_vm12 = vcmp.eq.s32.totalorder %v226_v39, 2  ;;  %vm228_vm13 = vcmp.eq.s32.totalorder %v226_v39, 0  ;;  %vm227_vm14 = vcmp.lt.s32.totalorder %v226_v39, 2 }
 0x131   :  { %v264_v10 = vadd.s32 4294967294, %v200_v9 }
 0x133   :  { %vm265_vm8 = vcmp.lt.s32.totalorder %v264_v10, 0 }
 0x134   :  { %v203_v12 = vsel %vm265_vm8, 0, %v264_v10 }
 0x135   :  { %v204_v15 = vsub.s32 32, %v203_v12  ;;  %v208_v16 = vsub.s32 4294967266, %v203_v12  ;;  %v205_v17 = vshll.u32 %v196_v6, %v203_v12 }
 0x137   :  { %v206_v18 = vshrl.u32 %v188_v13, %v204_v15  ;;  %v209_v19 = vadd.s32 127, %v208_v16 }
 0x139   :  { %v207_v20 = vor.u32 %v206_v18, %v205_v17  ;;  %v210_v21 = vshll.u32 %v209_v19, 23 }
 0x13b   :  { %v211_v22 = vor.u32 4788187, %v210_v21  ;;  %v214_v24 = vcvt.s32.f32 %v207_v20 }
 0x13d   :  { %v212_v23 = vand.u32 2147483647, %v211_v22 }
 0x13f   :  { %v215_v25 = vmul.f32 %v214_v24, %v212_v23 }
 0x141   :  { %v216_v27 = vxor.u32 2147483648, %v215_v25 }
 0x143   :  { %v217_v28 = vsel %vm134_vm9, %v216_v27, %v215_v25 }
 0x144   :  { %v220_v31 = vsel %vm133_vm10, %v457_v11, %v217_v28 }
 0x145   :  { %307 = vcosq.f32 %v220_v31 }
 0x146   :  { %309 = vsinq.f32 %v220_v31 }
 0x14f   :  { %v308_v14 = vpop.eup %307 }
 0x150   :  { %v310_v41 = vpop.eup %309  ;;  %v232_v42 = vxor.u32 2147483648, %v308_v14 }
 0x151   :  { %v229_v43 = vxor.u32 2147483648, %v310_v41 }
 0x152   :  { %v233_v44 = vsel %vm231_vm12, %v232_v42, %v310_v41 }
 0x153   :  { %v230_v45 = vsel %vm228_vm13, %v308_v14, %v229_v43 }
 0x154   :  { %v234_v46 = vsel %vm227_vm14, %v230_v45, %v233_v44 }
 0x155   :  { %v235_v47 = vsel %vm224_vm0, nan, %v234_v46 }
 0x156   :  { %v242_v48 = vsel %vm241_vm15, %v235_v47, %v457_v11 }
 0x157   :  { %243 = vst [vmem:[#allocation7] sm:$0xff] %v242_v48 }
 0x158   :  { %366 = shalt.err (!%p363_p6)
}
 0x159   :  { %s367_s20 = scalar_lea.hbm %s498_s4, 128 }
 0x15a   :  { %p368_p7 = scmp.ne.s32.totalorder %s498_s4, %s367_s20  ;;  %p371_p8 = scmp.lt.u32.totalorder %s367_s20, %s498_s4 }
 0x15c   :  { %p373_p9 = pnand %p371_p8, %p368_p7 }
 0x15e   :  { %376 = shalt.err (!%p373_p9)
}
 0x15f   :  { %253 = dma.vmem_to_hbm [thread:$0]  %s251_s17, 128, %s498_s4, [#allocation4]  }
 0x160   :  { %381 = dma.done.wait [#allocation4], 128  }
 0x161   :  { %382 = vsyncadd [#allocation4], 4294967168 }
 0x162   :  { %257 = vsyncpa [#allocation3], 1 }
 0x163   :  { %258 = vsyncpa [#allocation6], 1 }
 0x164   :  { %259 = vsyncpa [#allocation4], 1 }

</bundles_post_ra>
